<compile_context>
chip_gen: v7x
topology: tpu7x:2x2x1
jax: 0.10.0
libtpu: 0.0.40
codegen_flags: <defaults>
</compile_context>

<pallas_src>
import functools
import math

import jax
import jax.numpy as jnp
from jax import lax
from jax.experimental import pallas as pl
from jax.experimental.pallas import tpu as pltpu

_LANES = 128
_SUBLANES = 8


def _round_up(x, m):
    return ((x + m - 1) // m) * m


def _cdiv(a, b):
    return -(-a // b)


@functools.cache
def _vmem_limit_bytes():
    """Scoped-VMEM limit requested from the compiler (per-generation safe)."""
    try:
        cap = int(pltpu.get_tpu_info().vmem_capacity_bytes)
    except Exception:
        cap = 64 * 1024 * 1024  # conservative (v7x-sized) fallback
    cap = max(32 * 1024 * 1024, min(cap, 128 * 1024 * 1024))
    limit = int(min(cap * 3 // 4, 100 * 1024 * 1024))
    try:
        kind = jax.devices()[0].device_kind.lower()
    except Exception:
        kind = ""
    if "v7" in kind or "tpu7" in kind:
        # v7x has 64 MiB VMEM per TensorCore; never budget as if it were 128.
        limit = min(limit, 48 * 1024 * 1024)
    return limit


def _tiling(n_rows, width, itemsize):
    """Row tile tm, grid size and vmem limit.  No padding of the inputs:
    the last block may be partial and is masked in-kernel."""
    vmem_limit = _vmem_limit_bytes()
    if n_rows <= _SUBLANES:
        # Tiny input: one full-dim block (legal block shape even if not %8).
        return n_rows, 1, vmem_limit

    # Per-row VMEM footprint uses the lane-padded width; budget covers
    # 2 inputs x 2 pipeline buffers (native dtype) + ~3 tile-sized f32
    # intermediates of the roll/exp chain.
    padded_width = _round_up(width, _LANES)
    per_row_bytes = padded_width * (4 * itemsize + 3 * 4)
    budget = max(per_row_bytes * _SUBLANES, vmem_limit - (2 << 20))
    tm_cap = max(_SUBLANES, (budget // per_row_bytes) // _SUBLANES * _SUBLANES)

    floor8 = (n_rows // _SUBLANES) * _SUBLANES
    tm = min(tm_cap, floor8)
    # Ensure several grid steps when the problem is big enough: DMA/compute
    # overlap + both v7x TensorCores on the "parallel" axis.
    if n_rows >= 4 * _SUBLANES:
        tm = min(tm, _round_up(_cdiv(n_rows, 4), _SUBLANES))
    tm = max(tm, _SUBLANES)
    num_blocks = _cdiv(n_rows, tm)
    # Prefer an even block count (two v7x TensorCores) when there is >1 block.
    if num_blocks > 1 and num_blocks % 2 == 1:
        tm_alt = min(floor8, max(_SUBLANES,
                                 _round_up(_cdiv(n_rows, num_blocks + 1), _SUBLANES)))
        if _cdiv(n_rows, tm_alt) % 2 == 0:
            tm, num_blocks = tm_alt, _cdiv(n_rows, tm_alt)
    return tm, num_blocks, vmem_limit


def _make_packed_kernel(L, tm, n_rows):
    """g = 128 // L rows of length L packed per 128-lane row (L | 128, L < 128)."""
    shifts = []
    s = 1
    while s < L:
        shifts.append(s)
        s *= 2
    needs_row_mask = (n_rows % tm) != 0

    def kernel(s1_ref, s2_ref, out_ref):
        x1 = s1_ref[...]                       # (tm, 128) native dtype
        x2 = s2_ref[...]
        # Segmented max: log2(L) lane rotations per input (the only required
        # XLU work); maxima of each aligned L-lane group land in one lane.
        for sh in shifts:
            x1 = jnp.maximum(x1, pltpu.roll(x1, shift=sh, axis=1))
            x2 = jnp.maximum(x2, pltpu.roll(x2, shift=sh, axis=1))
        vals = jnp.exp(-jnp.abs(x1.astype(jnp.float32) - x2.astype(jnp.float32)))

        if needs_row_mask:                     # only the last partial block matters
            row = pl.program_id(0) * tm + lax.broadcasted_iota(
                jnp.int32, (tm, _LANES), 0)
            vals = jnp.where(row < n_rows, vals, 0.0)

        if L > 1:
            # Select the single lane per group whose accumulated rotation
            # window is exactly that group.  One extra (8,128) rotation makes
            # this independent of the hardware rotation direction (replaces
            # the old 2*log2(L)-roll iota min/max trees).
            lane = lax.broadcasted_iota(jnp.int32, (_SUBLANES, _LANES), 1)
            other = pltpu.roll(lane, shift=L - 1, axis=1)
            lo = jnp.minimum(lane, other)
            hi = jnp.maximum(lane, other)
            seg_mask = ((hi - lo) == (L - 1)) & ((lo & (L - 1)) == 0)  # (8,128)
        else:
            seg_mask = None                    # L == 1: every lane is a segment

        if tm % _SUBLANES == 0:
            vr = vals.reshape(tm // _SUBLANES, _SUBLANES, _LANES)
            if seg_mask is not None:
                vr = jnp.where(seg_mask[None], vr, 0.0)
            out_ref[...] = jnp.sum(vr, axis=0)                  # (8, 128) partials
        else:                                  # tiny single-block case only
            if seg_mask is not None:
                vals = jnp.where(seg_mask[:tm, :], vals, 0.0)
            col = jnp.sum(vals, axis=0, keepdims=True)          # (1, 128)
            sub = lax.broadcasted_iota(jnp.int32, (_SUBLANES, _LANES), 0)
            out_ref[...] = jnp.where(sub == 0, col, 0.0)

    return kernel


def _make_general_kernel(tm, n_rows):
    needs_row_mask = (n_rows % tm) != 0

    def kernel(s1_ref, s2_ref, out_ref):
        # max in the native dtype; only the (tm, 1) maxima are cast to f32.
        a = jnp.max(s1_ref[...], axis=-1, keepdims=True).astype(jnp.float32)
        b = jnp.max(s2_ref[...], axis=-1, keepdims=True).astype(jnp.float32)
        vals = jnp.exp(-jnp.abs(a - b))                          # (tm, 1)
        if needs_row_mask:
            row = pl.program_id(0) * tm + lax.broadcasted_iota(
                jnp.int32, (tm, 1), 0)
            vals = jnp.where(row < n_rows, vals, 0.0)
        lane = lax.broadcasted_iota(jnp.int32, (_SUBLANES, _LANES), 1)
        if tm % _SUBLANES == 0:
            part = jnp.sum(vals.reshape(tm // _SUBLANES, _SUBLANES, 1), axis=0)  # (8,1)
            out_ref[...] = jnp.where(lane == 0, part, 0.0)       # (8, 128)
        else:                                  # tiny single-block case only
            tot = jnp.sum(vals, keepdims=True)                   # (1, 1)
            sub = lax.broadcasted_iota(jnp.int32, (_SUBLANES, _LANES), 0)
            out_ref[...] = jnp.where((sub == 0) & (lane == 0), tot, 0.0)

    return kernel


def _proj_loss(s1, s2):
    assert s1.shape == s2.shape, "s1 and s2 must have the same shape"
    *lead, L = s1.shape
    N = int(math.prod(lead)) if lead else 1
    assert N > 0 and L > 0

    dtype = jnp.promote_types(s1.dtype, s2.dtype)
    if not jnp.issubdtype(dtype, jnp.floating):
        dtype = jnp.float32
    x1 = jnp.reshape(s1, (N, L)).astype(dtype)
    x2 = jnp.reshape(s2, (N, L)).astype(dtype)
    itemsize = jnp.dtype(dtype).itemsize

    g = _LANES // L if (L < _LANES and _LANES % L == 0) else 1
    # Packed path only when the row-major reshape is exact (free bitcast).
    packed = g > 1 and (N % g == 0)
    if packed:
        n_rows, width = N // g, _LANES
        x1 = x1.reshape(n_rows, _LANES)
        x2 = x2.reshape(n_rows, _LANES)
    else:
        # TODO(synk): for very large / ragged L a second "arbitrary" grid axis
        # over 128-lane chunks with a running-max scratch would keep tiles
        # lane-dense; not needed for mask-sized last dims.
        n_rows, width = N, L

    tm, num_blocks, vmem_limit = _tiling(n_rows, width, itemsize)
    kernel = (_make_packed_kernel(L, tm, n_rows) if packed
              else _make_general_kernel(tm, n_rows))

    partials = pl.pallas_call(
        kernel,
        out_shape=jax.ShapeDtypeStruct((num_blocks * _SUBLANES, _LANES), jnp.float32),
        grid_spec=pltpu.PrefetchScalarGridSpec(
            num_scalar_prefetch=0,
            grid=(num_blocks,),
            in_specs=[
                pl.BlockSpec((tm, width), lambda i: (i, 0)),
                pl.BlockSpec((tm, width), lambda i: (i, 0)),
            ],
            out_specs=pl.BlockSpec((_SUBLANES, _LANES), lambda i: (i, 0)),
        ),
        compiler_params=pltpu.CompilerParams(
            dimension_semantics=("parallel",),   # per-block partials -> no carry
            vmem_limit_bytes=vmem_limit,
        ),
        cost_estimate=pl.CostEstimate(
            flops=int(4 * n_rows * width),
            transcendentals=int(n_rows * (width if packed else 1)),
            bytes_accessed=int(2 * n_rows * width * itemsize
                               + num_blocks * _SUBLANES * _LANES * 4),
        ),
    )(x1, x2)

    total = jnp.sum(partials, dtype=jnp.float32)
    return (total / jnp.float32(N)).astype(jnp.float32)


proj_loss = jax.jit(_proj_loss)


def proj_loss_ref(s1, s2):
    a = jnp.max(s1, axis=-1)
    b = jnp.max(s2, axis=-1)
    return jnp.mean(jnp.exp(-jnp.abs(a - b)))


if __name__ == "__main__":
    key = jax.random.PRNGKey(0)
    ks = jax.random.split(key, 12)

    def check(a, b, ref):
        out = jax.block_until_ready(proj_loss(a, b))
        assert jnp.allclose(out, ref, rtol=1e-5, atol=1e-5), (out, ref)

    # 1) Primary case: mask-like (B, C, H, W) -> packed small-L path, 1 block.
    s1 = jax.random.normal(ks[0], (2, 4, 16, 16), dtype=jnp.float32)
    s2 = jax.random.normal(ks[1], (2, 4, 16, 16), dtype=jnp.float32)
    check(s1, s2, proj_loss_ref(s1, s2))

    # 2) Packed path, multi-block grid with a masked partial tail block.
    t1 = jax.random.normal(ks[2], (25, 16, 16), dtype=jnp.float32)
    t2 = jax.random.normal(ks[3], (25, 16, 16), dtype=jnp.float32)
    check(t1, t2, proj_loss_ref(t1, t2))

    # 3) N not a multiple of g -> pad-free general fallback with tail masking.
    u1 = jax.random.normal(ks[4], (3, 5, 16), dtype=jnp.float32)
    u2 = jax.random.normal(ks[5], (3, 5, 16), dtype=jnp.float32)
    check(u1, u2, proj_loss_ref(u1, u2))

    # 4) General path (L = 160 not a divisor of 128), masked tail.
    v1 = jax.random.normal(ks[6], (3, 5, 160), dtype=jnp.float32)
    v2 = jax.random.normal(ks[7], (3, 5, 160), dtype=jnp.float32)
    check(v1, v2, proj_loss_ref(v1, v2))

    # 5) General path, multi-block grid + masked tail.
    w1 = jax.random.normal(ks[8], (100, 3, 160), dtype=jnp.float32)
    w2 = jax.random.normal(ks[9], (100, 3, 160), dtype=jnp.float32)
    check(w1, w2, proj_loss_ref(w1, w2))

    # 6) bf16 inputs on the packed path (max in bf16, exp/mean in f32).
    b1 = jax.random.normal(ks[10], (2, 4, 16, 16), dtype=jnp.float32).astype(jnp.bfloat16)
    b2 = jax.random.normal(ks[11], (2, 4, 16, 16), dtype=jnp.float32).astype(jnp.bfloat16)
    check(b1, b2, proj_loss_ref(b1.astype(jnp.float32), b2.astype(jnp.float32)))

    print("KERNEL_OK")
</pallas_src>

<mosaic_0001>
module attributes {stable_mosaic.version = 11 : i64} {
  func.func @kernel(%arg0: i32, %arg1: memref<16x128xf32, #tpu.memory_space<vmem>>, %arg2: memref<16x128xf32, #tpu.memory_space<vmem>>, %arg3: memref<8x128xf32, #tpu.memory_space<vmem>>) attributes {dimension_semantics = [#tpu.dimension_semantics<parallel>], iteration_bounds = array<i64: 1>, scalar_prefetch = 0 : i64, scratch_operands = 0 : i64, tpu.core_type = #tpu.core_type<tc>, window_params = [{transform_indices = @transform_0, window_bounds = array<i64: 16, 128>}, {transform_indices = @transform_1, window_bounds = array<i64: 16, 128>}, {transform_indices = @transform_2, window_bounds = array<i64: 8, 128>}]} {
    %c0 = arith.constant 0 : index
    %c0_0 = arith.constant 0 : index
    %0 = vector.load %arg1[%c0, %c0_0] : memref<16x128xf32, #tpu.memory_space<vmem>>, vector<16x128xf32>
    %c0_1 = arith.constant 0 : index
    %c0_2 = arith.constant 0 : index
    %1 = vector.load %arg2[%c0_1, %c0_2] : memref<16x128xf32, #tpu.memory_space<vmem>>, vector<16x128xf32>
    %c1_i32 = arith.constant 1 : i32
    %2 = tpu.dynamic_rotate %0 by %c1_i32 dim 1 : vector<16x128xf32>, i32 -> vector<16x128xf32>
    %3 = arith.maximumf %0, %2 : vector<16x128xf32>
    %c1_i32_3 = arith.constant 1 : i32
    %4 = tpu.dynamic_rotate %1 by %c1_i32_3 dim 1 : vector<16x128xf32>, i32 -> vector<16x128xf32>
    %5 = arith.maximumf %1, %4 : vector<16x128xf32>
    %c2_i32 = arith.constant 2 : i32
    %6 = tpu.dynamic_rotate %3 by %c2_i32 dim 1 : vector<16x128xf32>, i32 -> vector<16x128xf32>
    %7 = arith.maximumf %3, %6 : vector<16x128xf32>
    %c2_i32_4 = arith.constant 2 : i32
    %8 = tpu.dynamic_rotate %5 by %c2_i32_4 dim 1 : vector<16x128xf32>, i32 -> vector<16x128xf32>
    %9 = arith.maximumf %5, %8 : vector<16x128xf32>
    %c4_i32 = arith.constant 4 : i32
    %10 = tpu.dynamic_rotate %7 by %c4_i32 dim 1 : vector<16x128xf32>, i32 -> vector<16x128xf32>
    %11 = arith.maximumf %7, %10 : vector<16x128xf32>
    %c4_i32_5 = arith.constant 4 : i32
    %12 = tpu.dynamic_rotate %9 by %c4_i32_5 dim 1 : vector<16x128xf32>, i32 -> vector<16x128xf32>
    %13 = arith.maximumf %9, %12 : vector<16x128xf32>
    %c8_i32 = arith.constant 8 : i32
    %14 = tpu.dynamic_rotate %11 by %c8_i32 dim 1 : vector<16x128xf32>, i32 -> vector<16x128xf32>
    %15 = arith.maximumf %11, %14 : vector<16x128xf32>
    %c8_i32_6 = arith.constant 8 : i32
    %16 = tpu.dynamic_rotate %13 by %c8_i32_6 dim 1 : vector<16x128xf32>, i32 -> vector<16x128xf32>
    %17 = arith.maximumf %13, %16 : vector<16x128xf32>
    %18 = arith.subf %15, %17 : vector<16x128xf32>
    %19 = math.absf %18 : vector<16x128xf32>
    %cst = arith.constant 0.000000e+00 : f32
    %20 = vector.broadcast %cst : f32 to vector<16x128xf32>
    %21 = arith.subf %20, %19 : vector<16x128xf32>
    %22 = math.exp %21 : vector<16x128xf32>
    %23 = tpu.iota {dimensions = array<i32: 1>} : vector<8x128xi32>
    %c15_i32 = arith.constant 15 : i32
    %24 = tpu.dynamic_rotate %23 by %c15_i32 dim 1 : vector<8x128xi32>, i32 -> vector<8x128xi32>
    %25 = arith.minsi %23, %24 : vector<8x128xi32>
    %26 = arith.maxsi %23, %24 : vector<8x128xi32>
    %27 = arith.subi %26, %25 : vector<8x128xi32>
    %c15_i32_7 = arith.constant 15 : i32
    %28 = vector.broadcast %c15_i32_7 : i32 to vector<8x128xi32>
    %29 = arith.cmpi eq, %27, %28 : vector<8x128xi32>
    %c15_i32_8 = arith.constant 15 : i32
    %30 = vector.broadcast %c15_i32_8 : i32 to vector<8x128xi32>
    %31 = arith.andi %25, %30 : vector<8x128xi32>
    %c0_i32 = arith.constant 0 : i32
    %32 = vector.broadcast %c0_i32 : i32 to vector<8x128xi32>
    %33 = arith.cmpi eq, %31, %32 : vector<8x128xi32>
    %34 = arith.andi %29, %33 : vector<8x128xi1>
    %35 = vector.shape_cast %22 : vector<16x128xf32> to vector<2x8x128xf32>
    %36 = vector.shape_cast %34 : vector<8x128xi1> to vector<1x8x128xi1>
    %cst_9 = arith.constant 0.000000e+00 : f32
    %37 = vector.shape_cast %36 : vector<1x8x128xi1> to vector<1x8x128xi1>
    %38 = vector.broadcast %37 : vector<1x8x128xi1> to vector<2x8x128xi1>
    %39 = vector.broadcast %cst_9 : f32 to vector<2x8x128xf32>
    %40 = arith.select %38, %35, %39 : vector<2x8x128xi1>, vector<2x8x128xf32>
    %cst_10 = arith.constant dense<0.000000e+00> : vector<8x128xf32>
    %41 = vector.multi_reduction <add>, %40, %cst_10 [0] : vector<2x8x128xf32> to vector<8x128xf32>
    %c0_11 = arith.constant 0 : index
    %c0_12 = arith.constant 0 : index
    %42 = vector.load %arg3[%c0_11, %c0_12] : memref<8x128xf32, #tpu.memory_space<vmem>>, vector<8x128xf32>
    tpu.vector_store %arg3[%c0_11, %c0_12], %41 {strides = array<i32>} : memref<8x128xf32, #tpu.memory_space<vmem>>, vector<8x128xf32>,
    return
  }
  func.func @transform_0(%arg0: i32) -> (i32, i32) {
    %c0_i32 = arith.constant 0 : i32
    %c0_i32_0 = arith.constant 0 : i32
    return %arg0, %c0_i32 : i32, i32
  }
  func.func @transform_1(%arg0: i32) -> (i32, i32) {
    %c0_i32 = arith.constant 0 : i32
    %c0_i32_0 = arith.constant 0 : i32
    return %arg0, %c0_i32 : i32, i32
  }
  func.func @transform_2(%arg0: i32) -> (i32, i32) {
    %c0_i32 = arith.constant 0 : i32
    %c0_i32_0 = arith.constant 0 : i32
    return %arg0, %c0_i32 : i32, i32
  }
}

</mosaic_0001>

<bundles_post_ra>
// kernel: _proj_loss.1
= control target key start
LH: loop header
LB: loop body
LE: loop exit
PB: predicated region body
PF: predicated region fallthrough
CT: control target
= control target key end

     0   :  { %s105_s13 = smov 1   ;;  %s106_s18 = smov 2   ;;  %v73_v22 = vlaneseq  ;;  %s140_s0 = inlined_call_operand.vmem [shape: f32[16,128], index: 0, kind: input, shape index: {}]   ;;  %s141_s1 = inlined_call_operand.vmem [shape: f32[16,128], index: 1, kind: input, shape index: {}]   ;;  %s142_s2 = inlined_call_operand.vmem [shape: f32[8,128], index: 2, kind: output, shape index: {}]  }
   0x1   :  { %v11_v0 = vld [vmem:[%s140_s0] sm:$0xff]  ;;  %v12_v2 = vld [vmem:[%s140_s0 + $0x8] sm:$0xff]  ;;  %s107_s0 = smov 4   ;;  %s109_s19 = smov 15  }
   0x2   :  { %v13_v1 = vld [vmem:[%s141_s1] sm:$0xff]  ;;  %15 = vrot.lane.b32.xlu0 %v11_v0, %s105_s13  ;;  %v14_v3 = vld [vmem:[%s141_s1 + $0x8] sm:$0xff]  ;;  %s108_s1 = smov 8   ;;  %v74_v27 = vand.u32 127, %v73_v22 }
   0x3   :  { %21 = vrot.lane.b32.xlu1 %v13_v1, %s105_s13 }
   0x6   :  { %17 = vrot.lane.b32.xlu0 %v12_v2, %s105_s13 }
   0x7   :  { %23 = vrot.lane.b32.xlu1 %v14_v3, %s105_s13 }
  0x74   :  { %v16_v4 = vpop.permute.xlu0 %15 }
  0x75   :  { %v22_v5 = vpop.permute.xlu1 %21  ;;  %v19_v6 = vmax.f32 %v11_v0, %v16_v4 }
  0x76   :  { %v25_v7 = vmax.f32 %v13_v1, %v22_v5 }
  0x77   :  { %27 = vrot.lane.b32.xlu0 %v19_v6, %s106_s18 }
  0x78   :  { %v18_v8 = vpop.permute.xlu0 %17 }
  0x79   :  { %v24_v9 = vpop.permute.xlu1 %23  ;;  %v20_v10 = vmax.f32 %v12_v2, %v18_v8 }
  0x7a   :  { %v26_v11 = vmax.f32 %v14_v3, %v24_v9 }
  0x7b   :  { %33 = vrot.lane.b32.xlu0 %v25_v7, %s106_s18  ;;  %29 = vrot.lane.b32.xlu1 %v20_v10, %s106_s18 }
  0x7f   :  { %35 = vrot.lane.b32.xlu1 %v26_v11, %s106_s18 }
  0xe9   :  { %v28_v12 = vpop.permute.xlu0 %27 }
  0xea   :  { %v31_v13 = vmax.f32 %v19_v6, %v28_v12 }
  0xec   :  { %39 = vrot.lane.b32.xlu0 %v31_v13, %s107_s0 }
  0xed   :  { %v30_v14 = vpop.permute.xlu1 %29  ;;  %v34_v15 = vpop.permute.xlu0 %33 }
  0xee   :  { %v32_v16 = vmax.f32 %v20_v10, %v30_v14  ;;  %v37_v17 = vmax.f32 %v25_v7, %v34_v15 }
  0xf0   :  { %41 = vrot.lane.b32.xlu1 %v32_v16, %s107_s0  ;;  %45 = vrot.lane.b32.xlu0 %v37_v17, %s107_s0 }
  0xf1   :  { %v36_v18 = vpop.permute.xlu1 %35 }
  0xf2   :  { %v38_v19 = vmax.f32 %v26_v11, %v36_v18 }
  0xf4   :  { %47 = vrot.lane.b32.xlu1 %v38_v19, %s107_s0 }
 0x15e   :  { %v40_v20 = vpop.permute.xlu0 %39 }
 0x15f   :  { %v43_v21 = vmax.f32 %v31_v13, %v40_v20 }
 0x161   :  { %51 = vrot.lane.b32.xlu0 %v43_v21, %s108_s1 }
 0x162   :  { %v42_v23 = vpop.permute.xlu1 %41  ;;  %v46_v24 = vpop.permute.xlu0 %45 }
 0x163   :  { %v44_v25 = vmax.f32 %v32_v16, %v42_v23  ;;  %v49_v26 = vmax.f32 %v37_v17, %v46_v24 }
 0x165   :  { %53 = vrot.lane.b32.xlu1 %v44_v25, %s108_s1  ;;  %57 = vrot.lane.b32.xlu0 %v49_v26, %s108_s1 }
 0x166   :  { %v48_v28 = vpop.permute.xlu1 %47 }
 0x167   :  { %v50_v29 = vmax.f32 %v38_v19, %v48_v28 }
 0x169   :  { %59 = vrot.lane.b32.xlu1 %v50_v29, %s108_s1  ;;  %75 = vrot.lane.b32.xlu0 %v74_v27, %s109_s19 }
 0x1d3   :  { %v52_v30 = vpop.permute.xlu0 %51 }
 0x1d4   :  { %v55_v33 = vmax.f32 %v43_v21, %v52_v30 }
 0x1d7   :  { %v54_v31 = vpop.permute.xlu1 %53  ;;  %v58_v32 = vpop.permute.xlu0 %57 }
 0x1d8   :  { %v61_v34 = vmax.f32 %v49_v26, %v58_v32  ;;  %v56_v37 = vmax.f32 %v44_v25, %v54_v31 }
 0x1da   :  { %v63_v35 = vsub.f32 %v55_v33, %v61_v34 }
 0x1db   :  { %v60_v36 = vpop.permute.xlu1 %59  ;;  %v76_v42 = vpop.permute.xlu0 %75 }
 0x1dc   :  { %v65_v38 = vand.u32 2147483647, %v63_v35  ;;  %v62_v39 = vmax.f32 %v50_v29, %v60_v36  ;;  %vm77_vm0 = vcmp.lt.s32.totalorder %v74_v27, %v76_v42  ;;  %vm79_vm1 = vcmp.gt.s32.totalorder %v74_v27, %v76_v42 }
 0x1dd   :  { %v78_v47 = vsel %vm77_vm0, %v74_v27, %v76_v42  ;;  %v80_v48 = vsel %vm79_vm1, %v74_v27, %v76_v42 }
 0x1de   :  { %v67_v40 = vsub.f32 0.0, %v65_v38  ;;  %v64_v41 = vsub.f32 %v56_v37, %v62_v39  ;;  %v81_v49 = vsub.s32 %v80_v48, %v78_v47  ;;  %v83_v50 = vand.u32 15, %v78_v47 }
 0x1e0   :  { %v69_v43 = vmul.f32 1.442695, %v67_v40  ;;  %v66_v44 = vand.u32 2147483647, %v64_v41  ;;  %vm82_vm2 = vcmp.eq.s32.totalorder %v81_v49, 15  ;;  %vm84_vm3 = vcmp.eq.s32.totalorder %v83_v50, 0 }
 0x1e1   :  { %vm85_vm4 = vmand %vm82_vm2, %vm84_vm3 }
 0x1e2   :  { %v68_v45 = vsub.f32 0.0, %v66_v44  ;;  %101 = vpow2.f32 %v69_v43 }
 0x1e4   :  { %v71_v46 = vmul.f32 1.442695, %v68_v45 }
 0x1e6   :  { %103 = vpow2.f32 %v71_v46 }
 0x1ec   :  { %v102_v51 = vpop.eup %101 }
 0x1ed   :  { %v88_v53 = vsel %vm85_vm4, %v102_v51, 0.0 }
 0x1f0   :  { %v104_v52 = vpop.eup %103 }
 0x1f1   :  { %v89_v54 = vsel %vm85_vm4, %v104_v52, 0.0 }
 0x1f2   :  { %v90_v55 = vadd.f32 %v89_v54, %v88_v53 }
 0x1f4   :  { %91 = vst [vmem:[%s142_s2] sm:$0xff] %v90_v55 }

</bundles_post_ra>
